<compile_context>
chip_gen: v6e
topology: v6e:2x2x1
jax: 0.10.0
libtpu: 0.0.40
codegen_flags: <defaults>
</compile_context>

<pallas_src>
import jax
import jax.numpy as jnp
from jax import lax
from jax.experimental import pallas as pl
from jax.experimental.pallas import tpu as pltpu


def _downsample_kernel(w_sref, x_ref, pool_ref, o_ref):
    """One (batch, row-tile) grid step.

    w_sref  : (Cout, Cin) f32 SMEM        -- 1x1 conv weights (scalar prefetch)
    x_ref   : (1, Cin, TH, 2*W) VMEM      -- packed rows: [row 2t | row 2t+1] on the lane axis
    pool_ref: (K, Wo) VMEM, K in {W, 2W}  -- pooling matrix (0.25 / 0.5 entries)
    o_ref   : (1, Cout, TH, Wo) VMEM      -- NCHW output tile
    """
    _, cin, th, w2 = x_ref.shape
    w_in = w2 // 2
    cout = o_ref.shape[1]
    wo = o_ref.shape[3]
    k_pool = pool_ref.shape[0]

    xt = x_ref[0]                                        # (Cin, TH, 2W)
    if k_pool == w_in:
        # Vertical 2-row sum on the VPU: two lane-contiguous halves of the packed row
        # (selected only when W % 128 == 0 -> exactly lane-aligned).  Halves matmul K.
        operand = xt[:, :, :w_in] + xt[:, :, w_in:]      # (Cin, TH, W)
    else:
        operand = xt                                     # (Cin, TH, 2W); exact fallback

    # ONE fused MXU matmul over all channels; f32 accumulation, operands stay in input dtype.
    mm = jnp.dot(operand.reshape(cin * th, k_pool), pool_ref[...],
                 preferred_element_type=jnp.float32)     # (Cin*TH, Wo)
    pooled = mm.reshape(cin, th, wo)                     # (Cin, TH, Wo) f32

    # 1x1 conv (bias=False): Cout x Cin scalar broadcast-FMAs on the VPU, f32 accumulation.
    # TODO(synk): switch to a channels-last MXU matmul past the Cin ~ 32 crossover.
    for co in range(cout):
        if cin <= 32:
            acc = w_sref[co, 0] * pooled[0]
            for ci in range(1, cin):
                acc = acc + w_sref[co, ci] * pooled[ci]
        else:
            def body(ci, a, _co=co):
                return a + w_sref[_co, ci] * lax.dynamic_index_in_dim(
                    pooled, ci, axis=0, keepdims=False)
            acc = lax.fori_loop(1, cin, body, w_sref[co, 0] * pooled[0])
        # TODO(synk): for Wo < 128 these stores are lane-sparse (vst.msk); pad Wo in the
        # out_shape if tiny feature maps ever become the hot path.
        o_ref[0, co] = acc.astype(o_ref.dtype)


def _tile_vmem_bytes(th, cin, cout, w_in, wo, k_pool, itemsize):
    """Honest per-step VMEM footprint: double-buffered input/output/pool blocks plus the
    in-kernel intermediates (vertical sum + f32 pooled planes + f32 accumulator)."""
    in_blk = cin * th * 2 * w_in * itemsize
    out_blk = cout * th * wo * itemsize
    pool_blk = k_pool * wo * itemsize
    interm = (cin * th * (w_in + wo) + th * wo) * 4
    return 2 * (in_blk + out_blk + pool_blk) + interm


def _choose_row_tile(ho, cin, cout, w_in, wo, k_pool, itemsize, n_batch,
                     budget_bytes, sublane):
    """Largest layout-friendly row tile TH (multiple of `sublane`, or == Ho) whose honest
    VMEM footprint fits the budget.  TH need not divide Ho (ragged last tile, masked
    writeback).  Mild preference for an even total grid-step count (v7x: 2 TensorCores)."""
    cands = sorted(set(range(sublane, ho + 1, sublane)) | {ho})
    fitting = [t for t in cands
               if _tile_vmem_bytes(t, cin, cout, w_in, wo, k_pool, itemsize) <= budget_bytes]
    if not fitting:
        fitting = [cands[0]]
    best = max(fitting)
    even = [t for t in fitting if (n_batch * (-(-ho // t))) % 2 == 0]
    if even and 2 * max(even) >= best:
        best = max(even)
    return best


def downsample(x_nchw, conv_weight):
    """AvgPool2d(2, ceil_mode=True, count_include_pad=False) + Conv2d(1x1, bias=False).

    x_nchw: (N, Cin, H, W); conv_weight: (Cout, Cin, 1, 1).
    Returns (N, Cout, ceil(H/2), ceil(W/2)) in NCHW.
    """
    n, cin, h, w_in = x_nchw.shape
    cout = conv_weight.shape[0]
    dt = x_nchw.dtype
    itemsize = jnp.dtype(dt).itemsize

    # ceil_mode output sizes.
    ho = -(-h // 2)
    wo = -(-w_in // 2)

    # Odd H: replicate the last row so the full 2-row sum equals 2x the single valid row;
    # the 1/(2*valid_cols) pool weights then reproduce the valid-count average exactly.
    # TODO(synk): a pl.when-guarded final row-tile would avoid this full-tensor pad copy.
    if h % 2:
        x_nchw = jnp.pad(x_nchw, ((0, 0), (0, 0), (0, 1), (0, 0)), mode="edge")
    # Odd W is handled entirely inside the pool matrix -- no wrapper pad.

    # Free contiguous reshape: packed row t = [input row 2t | input row 2t+1] (2W lanes).
    x_packed = x_nchw.reshape(n, cin, ho, 2 * w_in)

    # Pool matrix.  col_w[j] = 1 / (2 * #valid input cols of window j)
    # (count_include_pad=False semantics: 0.25 for full windows, 0.5 for the odd last column).
    use_vsum = (w_in % 128 == 0)           # vertical VPU sum + K=W matmul (lane-aligned halves)
    k_pool = w_in if use_vsum else 2 * w_in
    j = jnp.arange(wo)
    col_w = (1.0 / (2.0 * jnp.minimum(2, w_in - 2 * j))).astype(dt)          # (Wo,)
    k = jnp.arange(k_pool)
    src_col = k % w_in
    pool_mat = jnp.where((src_col[:, None] // 2) == j[None, :],
                         col_w[None, :], jnp.zeros((), dt)).astype(dt)        # (K, Wo)

    # 1x1 conv weights as f32 scalars for SMEM scalar prefetch.
    w_mat = conv_weight.reshape(cout, cin).astype(jnp.float32)

    # Generation-aware VMEM budgeting with headroom for compiler scratch / semaphores.
    try:
        vmem_cap = int(pltpu.get_tpu_info().vmem_capacity_bytes)
    except Exception:
        vmem_cap = 64 << 20            # v7x per-TensorCore physical VMEM (most restrictive)
    vmem_target = int(0.75 * vmem_cap)
    tile_budget = int(0.6 * vmem_target)

    sublane = {1: 32, 2: 16}.get(itemsize, 8)   # dtype-aware second-minor tile multiple
    th = _choose_row_tile(ho, cin, cout, w_in, wo, k_pool, itemsize, n,
                          tile_budget, sublane)
    n_row_tiles = pl.cdiv(ho, th)

    honest = _tile_vmem_bytes(th, cin, cout, w_in, wo, k_pool, itemsize)
    vmem_limit = int(min(vmem_target, max(2 * honest + (16 << 20), 32 << 20)))

    out = pl.pallas_call(
        _downsample_kernel,
        out_shape=jax.ShapeDtypeStruct((n, cout, ho, wo), dt),
        grid_spec=pltpu.PrefetchScalarGridSpec(
            num_scalar_prefetch=1,
            grid=(n, n_row_tiles),
            in_specs=[
                pl.BlockSpec((1, cin, th, 2 * w_in), lambda b, r, wref: (b, 0, r, 0)),
                pl.BlockSpec((k_pool, wo), lambda b, r, wref: (0, 0)),
            ],
            out_specs=pl.BlockSpec((1, cout, th, wo), lambda b, r, wref: (b, 0, r, 0)),
        ),
        compiler_params=pltpu.CompilerParams(
            dimension_semantics=("parallel", "parallel"),
            vmem_limit_bytes=vmem_limit,
        ),
    )(w_mat, x_packed, pool_mat)
    return out


def _reference(x_nchw, conv_weight):
    """Pure-JAX AvgPool2d(2, ceil_mode=True, count_include_pad=False) + 1x1 conv (no bias)."""
    n, c, h, w = x_nchw.shape
    ho, wo = -(-h // 2), -(-w // 2)
    xz = jnp.pad(x_nchw.astype(jnp.float32),
                 ((0, 0), (0, 0), (0, 2 * ho - h), (0, 2 * wo - w)))
    s = xz.reshape(n, c, ho, 2, wo, 2).sum(axis=(3, 5))
    cnt = (jnp.minimum(2, h - 2 * jnp.arange(ho))[:, None]
           * jnp.minimum(2, w - 2 * jnp.arange(wo))[None, :]).astype(jnp.float32)
    pooled = s / cnt
    return jnp.einsum("oc,nchw->nohw",
                      conv_weight[:, :, 0, 0].astype(jnp.float32), pooled)


if __name__ == "__main__":
    key = jax.random.PRNGKey(0)
    k1, k2, k3 = jax.random.split(key, 3)

    # Shapes consistent with the module: batch=2, in_channels=4, spatial=16,
    # chan_factor=2 -> out_channels = int(4 * 2) = 8.
    N, Cin, H, W = 2, 4, 16, 16
    chan_factor = 2
    Cout = int(Cin * chan_factor)

    x = jax.random.normal(k1, (N, Cin, H, W), dtype=jnp.float32)
    conv_w = jax.random.normal(k2, (Cout, Cin, 1, 1), dtype=jnp.float32) * 0.1

    out = jax.block_until_ready(downsample(x, conv_w))
    ref = _reference(x, conv_w)
    assert out.shape == (N, Cout, H // 2, W // 2), out.shape
    assert jnp.allclose(out, ref, atol=1e-5, rtol=1e-5), "even-shape mismatch vs reference"

    # Odd spatial dims exercise ceil_mode=True + count_include_pad=False exactly.
    H2, W2 = 15, 13
    x2 = jax.random.normal(k3, (N, Cin, H2, W2), dtype=jnp.float32)
    out2 = jax.block_until_ready(downsample(x2, conv_w))
    ref2 = _reference(x2, conv_w)
    assert out2.shape == (N, Cout, (H2 + 1) // 2, (W2 + 1) // 2), out2.shape
    assert jnp.allclose(out2, ref2, atol=1e-5, rtol=1e-5), "odd-shape (ceil_mode) mismatch"

    print("KERNEL_OK")
</pallas_src>

<mosaic_0001>
module attributes {stable_mosaic.version = 11 : i64} {
  func.func @_downsample_kernel(%arg0: i32, %arg1: i32, %arg2: memref<8x4xf32, #tpu.memory_space<smem>>, %arg3: memref<1x4x8x32xf32, #tpu.memory_space<vmem>>, %arg4: memref<32x8xf32, #tpu.memory_space<vmem>>, %arg5: memref<1x8x8x8xf32, #tpu.memory_space<vmem>>) attributes {dimension_semantics = [#tpu.dimension_semantics<parallel>, #tpu.dimension_semantics<parallel>], iteration_bounds = array<i64: 2, 1>, scalar_prefetch = 1 : i64, scratch_operands = 0 : i64, tpu.core_type = #tpu.core_type<tc>, window_params = [{transform_indices = @transform_0, window_bounds = array<i64: 1, 4, 8, 32>}, {pipeline_mode = #tpu.pipeline_mode<synchronous>, transform_indices = @transform_1, window_bounds = array<i64: 32, 8>}, {transform_indices = @transform_2, window_bounds = array<i64: 1, 8, 8, 8>}]} {
    %c0 = arith.constant 0 : index
    %c0_0 = arith.constant 0 : index
    %c0_1 = arith.constant 0 : index
    %c0_2 = arith.constant 0 : index
    %0 = vector.load %arg3[%c0, %c0_0, %c0_1, %c0_2] : memref<1x4x8x32xf32, #tpu.memory_space<vmem>>, vector<1x4x8x32xf32>
    %1 = vector.shape_cast %0 : vector<1x4x8x32xf32> to vector<4x8x32xf32>
    %2 = vector.shape_cast %1 : vector<4x8x32xf32> to vector<32x32xf32>
    %c0_3 = arith.constant 0 : index
    %c0_4 = arith.constant 0 : index
    %3 = vector.load %arg4[%c0_3, %c0_4] : memref<32x8xf32, #tpu.memory_space<vmem>>, vector<32x8xf32>
    %cst = arith.constant dense<0.000000e+00> : vector<32x8xf32>
    %4 = tpu.matmul %2, %3, %cst {dimension_numbers = #tpu.dot_dimension_numbers<[1], [0], [0], [1], [0, 0, 1, 1], [], []>} : vector<32x32xf32>, vector<32x8xf32>, vector<32x8xf32> -> vector<32x8xf32>
    %5 = vector.shape_cast %4 : vector<32x8xf32> to vector<4x8x8xf32>
    %c0_5 = arith.constant 0 : index
    %c0_6 = arith.constant 0 : index
    %6 = memref.load %arg2[%c0_5, %c0_6] : memref<8x4xf32, #tpu.memory_space<smem>>
    %7 = vector.extract_strided_slice %5 {offsets = [0, 0, 0], sizes = [1, 8, 8], strides = [1, 1, 1]} : vector<4x8x8xf32> to vector<1x8x8xf32>
    %8 = vector.shape_cast %7 : vector<1x8x8xf32> to vector<8x8xf32>
    %9 = vector.broadcast %6 : f32 to vector<8x8xf32>
    %10 = arith.mulf %9, %8 : vector<8x8xf32>
    %c0_7 = arith.constant 0 : index
    %c1 = arith.constant 1 : index
    %11 = memref.load %arg2[%c0_7, %c1] : memref<8x4xf32, #tpu.memory_space<smem>>
    %12 = vector.extract_strided_slice %5 {offsets = [1, 0, 0], sizes = [1, 8, 8], strides = [1, 1, 1]} : vector<4x8x8xf32> to vector<1x8x8xf32>
    %13 = vector.shape_cast %12 : vector<1x8x8xf32> to vector<8x8xf32>
    %14 = vector.broadcast %11 : f32 to vector<8x8xf32>
    %15 = arith.mulf %14, %13 : vector<8x8xf32>
    %16 = arith.addf %10, %15 : vector<8x8xf32>
    %c0_8 = arith.constant 0 : index
    %c2 = arith.constant 2 : index
    %17 = memref.load %arg2[%c0_8, %c2] : memref<8x4xf32, #tpu.memory_space<smem>>
    %18 = vector.extract_strided_slice %5 {offsets = [2, 0, 0], sizes = [1, 8, 8], strides = [1, 1, 1]} : vector<4x8x8xf32> to vector<1x8x8xf32>
    %19 = vector.shape_cast %18 : vector<1x8x8xf32> to vector<8x8xf32>
    %20 = vector.broadcast %17 : f32 to vector<8x8xf32>
    %21 = arith.mulf %20, %19 : vector<8x8xf32>
    %22 = arith.addf %16, %21 : vector<8x8xf32>
    %c0_9 = arith.constant 0 : index
    %c3 = arith.constant 3 : index
    %23 = memref.load %arg2[%c0_9, %c3] : memref<8x4xf32, #tpu.memory_space<smem>>
    %24 = vector.extract_strided_slice %5 {offsets = [3, 0, 0], sizes = [1, 8, 8], strides = [1, 1, 1]} : vector<4x8x8xf32> to vector<1x8x8xf32>
    %25 = vector.shape_cast %24 : vector<1x8x8xf32> to vector<8x8xf32>
    %26 = vector.broadcast %23 : f32 to vector<8x8xf32>
    %27 = arith.mulf %26, %25 : vector<8x8xf32>
    %28 = arith.addf %22, %27 : vector<8x8xf32>
    %c0_10 = arith.constant 0 : index
    %c0_11 = arith.constant 0 : index
    %c0_12 = arith.constant 0 : index
    %c0_13 = arith.constant 0 : index
    %29 = vector.load %arg5[%c0_10, %c0_11, %c0_12, %c0_13] : memref<1x8x8x8xf32, #tpu.memory_space<vmem>>, vector<1x1x8x8xf32>
    %30 = vector.shape_cast %29 : vector<1x1x8x8xf32> to vector<8x8xf32>
    %31 = vector.shape_cast %28 : vector<8x8xf32> to vector<1x1x8x8xf32>
    tpu.vector_store %arg5[%c0_10, %c0_11, %c0_12, %c0_13], %31 {strides = array<i32>} : memref<1x8x8x8xf32, #tpu.memory_space<vmem>>, vector<1x1x8x8xf32>,
    %c1_14 = arith.constant 1 : index
    %c0_15 = arith.constant 0 : index
    %32 = memref.load %arg2[%c1_14, %c0_15] : memref<8x4xf32, #tpu.memory_space<smem>>
    %33 = vector.extract_strided_slice %5 {offsets = [0, 0, 0], sizes = [1, 8, 8], strides = [1, 1, 1]} : vector<4x8x8xf32> to vector<1x8x8xf32>
    %34 = vector.shape_cast %33 : vector<1x8x8xf32> to vector<8x8xf32>
    %35 = vector.broadcast %32 : f32 to vector<8x8xf32>
    %36 = arith.mulf %35, %34 : vector<8x8xf32>
    %c1_16 = arith.constant 1 : index
    %c1_17 = arith.constant 1 : index
    %37 = memref.load %arg2[%c1_16, %c1_17] : memref<8x4xf32, #tpu.memory_space<smem>>
    %38 = vector.extract_strided_slice %5 {offsets = [1, 0, 0], sizes = [1, 8, 8], strides = [1, 1, 1]} : vector<4x8x8xf32> to vector<1x8x8xf32>
    %39 = vector.shape_cast %38 : vector<1x8x8xf32> to vector<8x8xf32>
    %40 = vector.broadcast %37 : f32 to vector<8x8xf32>
    %41 = arith.mulf %40, %39 : vector<8x8xf32>
    %42 = arith.addf %36, %41 : vector<8x8xf32>
    %c1_18 = arith.constant 1 : index
    %c2_19 = arith.constant 2 : index
    %43 = memref.load %arg2[%c1_18, %c2_19] : memref<8x4xf32, #tpu.memory_space<smem>>
    %44 = vector.extract_strided_slice %5 {offsets = [2, 0, 0], sizes = [1, 8, 8], strides = [1, 1, 1]} : vector<4x8x8xf32> to vector<1x8x8xf32>
    %45 = vector.shape_cast %44 : vector<1x8x8xf32> to vector<8x8xf32>
    %46 = vector.broadcast %43 : f32 to vector<8x8xf32>
    %47 = arith.mulf %46, %45 : vector<8x8xf32>
    %48 = arith.addf %42, %47 : vector<8x8xf32>
    %c1_20 = arith.constant 1 : index
    %c3_21 = arith.constant 3 : index
    %49 = memref.load %arg2[%c1_20, %c3_21] : memref<8x4xf32, #tpu.memory_space<smem>>
    %50 = vector.extract_strided_slice %5 {offsets = [3, 0, 0], sizes = [1, 8, 8], strides = [1, 1, 1]} : vector<4x8x8xf32> to vector<1x8x8xf32>
    %51 = vector.shape_cast %50 : vector<1x8x8xf32> to vector<8x8xf32>
    %52 = vector.broadcast %49 : f32 to vector<8x8xf32>
    %53 = arith.mulf %52, %51 : vector<8x8xf32>
    %54 = arith.addf %48, %53 : vector<8x8xf32>
    %c0_22 = arith.constant 0 : index
    %c1_23 = arith.constant 1 : index
    %c0_24 = arith.constant 0 : index
    %c0_25 = arith.constant 0 : index
    %55 = vector.load %arg5[%c0_22, %c1_23, %c0_24, %c0_25] : memref<1x8x8x8xf32, #tpu.memory_space<vmem>>, vector<1x1x8x8xf32>
    %56 = vector.shape_cast %55 : vector<1x1x8x8xf32> to vector<8x8xf32>
    %57 = vector.shape_cast %54 : vector<8x8xf32> to vector<1x1x8x8xf32>
    tpu.vector_store %arg5[%c0_22, %c1_23, %c0_24, %c0_25], %57 {strides = array<i32>} : memref<1x8x8x8xf32, #tpu.memory_space<vmem>>, vector<1x1x8x8xf32>,
    %c2_26 = arith.constant 2 : index
    %c0_27 = arith.constant 0 : index
    %58 = memref.load %arg2[%c2_26, %c0_27] : memref<8x4xf32, #tpu.memory_space<smem>>
    %59 = vector.extract_strided_slice %5 {offsets = [0, 0, 0], sizes = [1, 8, 8], strides = [1, 1, 1]} : vector<4x8x8xf32> to vector<1x8x8xf32>
    %60 = vector.shape_cast %59 : vector<1x8x8xf32> to vector<8x8xf32>
    %61 = vector.broadcast %58 : f32 to vector<8x8xf32>
    %62 = arith.mulf %61, %60 : vector<8x8xf32>
    %c2_28 = arith.constant 2 : index
    %c1_29 = arith.constant 1 : index
    %63 = memref.load %arg2[%c2_28, %c1_29] : memref<8x4xf32, #tpu.memory_space<smem>>
    %64 = vector.extract_strided_slice %5 {offsets = [1, 0, 0], sizes = [1, 8, 8], strides = [1, 1, 1]} : vector<4x8x8xf32> to vector<1x8x8xf32>
    %65 = vector.shape_cast %64 : vector<1x8x8xf32> to vector<8x8xf32>
    %66 = vector.broadcast %63 : f32 to vector<8x8xf32>
    %67 = arith.mulf %66, %65 : vector<8x8xf32>
    %68 = arith.addf %62, %67 : vector<8x8xf32>
    %c2_30 = arith.constant 2 : index
    %c2_31 = arith.constant 2 : index
    %69 = memref.load %arg2[%c2_30, %c2_31] : memref<8x4xf32, #tpu.memory_space<smem>>
    %70 = vector.extract_strided_slice %5 {offsets = [2, 0, 0], sizes = [1, 8, 8], strides = [1, 1, 1]} : vector<4x8x8xf32> to vector<1x8x8xf32>
    %71 = vector.shape_cast %70 : vector<1x8x8xf32> to vector<8x8xf32>
    %72 = vector.broadcast %69 : f32 to vector<8x8xf32>
    %73 = arith.mulf %72, %71 : vector<8x8xf32>
    %74 = arith.addf %68, %73 : vector<8x8xf32>
    %c2_32 = arith.constant 2 : index
    %c3_33 = arith.constant 3 : index
    %75 = memref.load %arg2[%c2_32, %c3_33] : memref<8x4xf32, #tpu.memory_space<smem>>
    %76 = vector.extract_strided_slice %5 {offsets = [3, 0, 0], sizes = [1, 8, 8], strides = [1, 1, 1]} : vector<4x8x8xf32> to vector<1x8x8xf32>
    %77 = vector.shape_cast %76 : vector<1x8x8xf32> to vector<8x8xf32>
    %78 = vector.broadcast %75 : f32 to vector<8x8xf32>
    %79 = arith.mulf %78, %77 : vector<8x8xf32>
    %80 = arith.addf %74, %79 : vector<8x8xf32>
    %c0_34 = arith.constant 0 : index
    %c2_35 = arith.constant 2 : index
    %c0_36 = arith.constant 0 : index
    %c0_37 = arith.constant 0 : index
    %81 = vector.load %arg5[%c0_34, %c2_35, %c0_36, %c0_37] : memref<1x8x8x8xf32, #tpu.memory_space<vmem>>, vector<1x1x8x8xf32>
    %82 = vector.shape_cast %81 : vector<1x1x8x8xf32> to vector<8x8xf32>
    %83 = vector.shape_cast %80 : vector<8x8xf32> to vector<1x1x8x8xf32>
    tpu.vector_store %arg5[%c0_34, %c2_35, %c0_36, %c0_37], %83 {strides = array<i32>} : memref<1x8x8x8xf32, #tpu.memory_space<vmem>>, vector<1x1x8x8xf32>,
    %c3_38 = arith.constant 3 : index
    %c0_39 = arith.constant 0 : index
    %84 = memref.load %arg2[%c3_38, %c0_39] : memref<8x4xf32, #tpu.memory_space<smem>>
    %85 = vector.extract_strided_slice %5 {offsets = [0, 0, 0], sizes = [1, 8, 8], strides = [1, 1, 1]} : vector<4x8x8xf32> to vector<1x8x8xf32>
    %86 = vector.shape_cast %85 : vector<1x8x8xf32> to vector<8x8xf32>
    %87 = vector.broadcast %84 : f32 to vector<8x8xf32>
    %88 = arith.mulf %87, %86 : vector<8x8xf32>
    %c3_40 = arith.constant 3 : index
    %c1_41 = arith.constant 1 : index
    %89 = memref.load %arg2[%c3_40, %c1_41] : memref<8x4xf32, #tpu.memory_space<smem>>
    %90 = vector.extract_strided_slice %5 {offsets = [1, 0, 0], sizes = [1, 8, 8], strides = [1, 1, 1]} : vector<4x8x8xf32> to vector<1x8x8xf32>
    %91 = vector.shape_cast %90 : vector<1x8x8xf32> to vector<8x8xf32>
    %92 = vector.broadcast %89 : f32 to vector<8x8xf32>
    %93 = arith.mulf %92, %91 : vector<8x8xf32>
    %94 = arith.addf %88, %93 : vector<8x8xf32>
    %c3_42 = arith.constant 3 : index
    %c2_43 = arith.constant 2 : index
    %95 = memref.load %arg2[%c3_42, %c2_43] : memref<8x4xf32, #tpu.memory_space<smem>>
    %96 = vector.extract_strided_slice %5 {offsets = [2, 0, 0], sizes = [1, 8, 8], strides = [1, 1, 1]} : vector<4x8x8xf32> to vector<1x8x8xf32>
    %97 = vector.shape_cast %96 : vector<1x8x8xf32> to vector<8x8xf32>
    %98 = vector.broadcast %95 : f32 to vector<8x8xf32>
    %99 = arith.mulf %98, %97 : vector<8x8xf32>
    %100 = arith.addf %94, %99 : vector<8x8xf32>
    %c3_44 = arith.constant 3 : index
    %c3_45 = arith.constant 3 : index
    %101 = memref.load %arg2[%c3_44, %c3_45] : memref<8x4xf32, #tpu.memory_space<smem>>
    %102 = vector.extract_strided_slice %5 {offsets = [3, 0, 0], sizes = [1, 8, 8], strides = [1, 1, 1]} : vector<4x8x8xf32> to vector<1x8x8xf32>
    %103 = vector.shape_cast %102 : vector<1x8x8xf32> to vector<8x8xf32>
    %104 = vector.broadcast %101 : f32 to vector<8x8xf32>
    %105 = arith.mulf %104, %103 : vector<8x8xf32>
    %106 = arith.addf %100, %105 : vector<8x8xf32>
    %c0_46 = arith.constant 0 : index
    %c3_47 = arith.constant 3 : index
    %c0_48 = arith.constant 0 : index
    %c0_49 = arith.constant 0 : index
    %107 = vector.load %arg5[%c0_46, %c3_47, %c0_48, %c0_49] : memref<1x8x8x8xf32, #tpu.memory_space<vmem>>, vector<1x1x8x8xf32>
    %108 = vector.shape_cast %107 : vector<1x1x8x8xf32> to vector<8x8xf32>
    %109 = vector.shape_cast %106 : vector<8x8xf32> to vector<1x1x8x8xf32>
    tpu.vector_store %arg5[%c0_46, %c3_47, %c0_48, %c0_49], %109 {strides = array<i32>} : memref<1x8x8x8xf32, #tpu.memory_space<vmem>>, vector<1x1x8x8xf32>,
    %c4 = arith.constant 4 : index
    %c0_50 = arith.constant 0 : index
    %110 = memref.load %arg2[%c4, %c0_50] : memref<8x4xf32, #tpu.memory_space<smem>>
    %111 = vector.extract_strided_slice %5 {offsets = [0, 0, 0], sizes = [1, 8, 8], strides = [1, 1, 1]} : vector<4x8x8xf32> to vector<1x8x8xf32>
    %112 = vector.shape_cast %111 : vector<1x8x8xf32> to vector<8x8xf32>
    %113 = vector.broadcast %110 : f32 to vector<8x8xf32>
    %114 = arith.mulf %113, %112 : vector<8x8xf32>
    %c4_51 = arith.constant 4 : index
    %c1_52 = arith.constant 1 : index
    %115 = memref.load %arg2[%c4_51, %c1_52] : memref<8x4xf32, #tpu.memory_space<smem>>
    %116 = vector.extract_strided_slice %5 {offsets = [1, 0, 0], sizes = [1, 8, 8], strides = [1, 1, 1]} : vector<4x8x8xf32> to vector<1x8x8xf32>
    %117 = vector.shape_cast %116 : vector<1x8x8xf32> to vector<8x8xf32>
    %118 = vector.broadcast %115 : f32 to vector<8x8xf32>
    %119 = arith.mulf %118, %117 : vector<8x8xf32>
    %120 = arith.addf %114, %119 : vector<8x8xf32>
    %c4_53 = arith.constant 4 : index
    %c2_54 = arith.constant 2 : index
    %121 = memref.load %arg2[%c4_53, %c2_54] : memref<8x4xf32, #tpu.memory_space<smem>>
    %122 = vector.extract_strided_slice %5 {offsets = [2, 0, 0], sizes = [1, 8, 8], strides = [1, 1, 1]} : vector<4x8x8xf32> to vector<1x8x8xf32>
    %123 = vector.shape_cast %122 : vector<1x8x8xf32> to vector<8x8xf32>
    %124 = vector.broadcast %121 : f32 to vector<8x8xf32>
    %125 = arith.mulf %124, %123 : vector<8x8xf32>
    %126 = arith.addf %120, %125 : vector<8x8xf32>
    %c4_55 = arith.constant 4 : index
    %c3_56 = arith.constant 3 : index
    %127 = memref.load %arg2[%c4_55, %c3_56] : memref<8x4xf32, #tpu.memory_space<smem>>
    %128 = vector.extract_strided_slice %5 {offsets = [3, 0, 0], sizes = [1, 8, 8], strides = [1, 1, 1]} : vector<4x8x8xf32> to vector<1x8x8xf32>
    %129 = vector.shape_cast %128 : vector<1x8x8xf32> to vector<8x8xf32>
    %130 = vector.broadcast %127 : f32 to vector<8x8xf32>
    %131 = arith.mulf %130, %129 : vector<8x8xf32>
    %132 = arith.addf %126, %131 : vector<8x8xf32>
    %c0_57 = arith.constant 0 : index
    %c4_58 = arith.constant 4 : index
    %c0_59 = arith.constant 0 : index
    %c0_60 = arith.constant 0 : index
    %133 = vector.load %arg5[%c0_57, %c4_58, %c0_59, %c0_60] : memref<1x8x8x8xf32, #tpu.memory_space<vmem>>, vector<1x1x8x8xf32>
    %134 = vector.shape_cast %133 : vector<1x1x8x8xf32> to vector<8x8xf32>
    %135 = vector.shape_cast %132 : vector<8x8xf32> to vector<1x1x8x8xf32>
    tpu.vector_store %arg5[%c0_57, %c4_58, %c0_59, %c0_60], %135 {strides = array<i32>} : memref<1x8x8x8xf32, #tpu.memory_space<vmem>>, vector<1x1x8x8xf32>,
    %c5 = arith.constant 5 : index
    %c0_61 = arith.constant 0 : index
    %136 = memref.load %arg2[%c5, %c0_61] : memref<8x4xf32, #tpu.memory_space<smem>>
    %137 = vector.extract_strided_slice %5 {offsets = [0, 0, 0], sizes = [1, 8, 8], strides = [1, 1, 1]} : vector<4x8x8xf32> to vector<1x8x8xf32>
    %138 = vector.shape_cast %137 : vector<1x8x8xf32> to vector<8x8xf32>
    %139 = vector.broadcast %136 : f32 to vector<8x8xf32>
    %140 = arith.mulf %139, %138 : vector<8x8xf32>
    %c5_62 = arith.constant 5 : index
    %c1_63 = arith.constant 1 : index
    %141 = memref.load %arg2[%c5_62, %c1_63] : memref<8x4xf32, #tpu.memory_space<smem>>
    %142 = vector.extract_strided_slice %5 {offsets = [1, 0, 0], sizes = [1, 8, 8], strides = [1, 1, 1]} : vector<4x8x8xf32> to vector<1x8x8xf32>
    %143 = vector.shape_cast %142 : vector<1x8x8xf32> to vector<8x8xf32>
    %144 = vector.broadcast %141 : f32 to vector<8x8xf32>
    %145 = arith.mulf %144, %143 : vector<8x8xf32>
    %146 = arith.addf %140, %145 : vector<8x8xf32>
    %c5_64 = arith.constant 5 : index
    %c2_65 = arith.constant 2 : index
    %147 = memref.load %arg2[%c5_64, %c2_65] : memref<8x4xf32, #tpu.memory_space<smem>>
    %148 = vector.extract_strided_slice %5 {offsets = [2, 0, 0], sizes = [1, 8, 8], strides = [1, 1, 1]} : vector<4x8x8xf32> to vector<1x8x8xf32>
    %149 = vector.shape_cast %148 : vector<1x8x8xf32> to vector<8x8xf32>
    %150 = vector.broadcast %147 : f32 to vector<8x8xf32>
    %151 = arith.mulf %150, %149 : vector<8x8xf32>
    %152 = arith.addf %146, %151 : vector<8x8xf32>
    %c5_66 = arith.constant 5 : index
    %c3_67 = arith.constant 3 : index
    %153 = memref.load %arg2[%c5_66, %c3_67] : memref<8x4xf32, #tpu.memory_space<smem>>
    %154 = vector.extract_strided_slice %5 {offsets = [3, 0, 0], sizes = [1, 8, 8], strides = [1, 1, 1]} : vector<4x8x8xf32> to vector<1x8x8xf32>
    %155 = vector.shape_cast %154 : vector<1x8x8xf32> to vector<8x8xf32>
    %156 = vector.broadcast %153 : f32 to vector<8x8xf32>
    %157 = arith.mulf %156, %155 : vector<8x8xf32>
    %158 = arith.addf %152, %157 : vector<8x8xf32>
    %c0_68 = arith.constant 0 : index
    %c5_69 = arith.constant 5 : index
    %c0_70 = arith.constant 0 : index
    %c0_71 = arith.constant 0 : index
    %159 = vector.load %arg5[%c0_68, %c5_69, %c0_70, %c0_71] : memref<1x8x8x8xf32, #tpu.memory_space<vmem>>, vector<1x1x8x8xf32>
    %160 = vector.shape_cast %159 : vector<1x1x8x8xf32> to vector<8x8xf32>
    %161 = vector.shape_cast %158 : vector<8x8xf32> to vector<1x1x8x8xf32>
    tpu.vector_store %arg5[%c0_68, %c5_69, %c0_70, %c0_71], %161 {strides = array<i32>} : memref<1x8x8x8xf32, #tpu.memory_space<vmem>>, vector<1x1x8x8xf32>,
    %c6 = arith.constant 6 : index
    %c0_72 = arith.constant 0 : index
    %162 = memref.load %arg2[%c6, %c0_72] : memref<8x4xf32, #tpu.memory_space<smem>>
    %163 = vector.extract_strided_slice %5 {offsets = [0, 0, 0], sizes = [1, 8, 8], strides = [1, 1, 1]} : vector<4x8x8xf32> to vector<1x8x8xf32>
    %164 = vector.shape_cast %163 : vector<1x8x8xf32> to vector<8x8xf32>
    %165 = vector.broadcast %162 : f32 to vector<8x8xf32>
    %166 = arith.mulf %165, %164 : vector<8x8xf32>
    %c6_73 = arith.constant 6 : index
    %c1_74 = arith.constant 1 : index
    %167 = memref.load %arg2[%c6_73, %c1_74] : memref<8x4xf32, #tpu.memory_space<smem>>
    %168 = vector.extract_strided_slice %5 {offsets = [1, 0, 0], sizes = [1, 8, 8], strides = [1, 1, 1]} : vector<4x8x8xf32> to vector<1x8x8xf32>
    %169 = vector.shape_cast %168 : vector<1x8x8xf32> to vector<8x8xf32>
    %170 = vector.broadcast %167 : f32 to vector<8x8xf32>
    %171 = arith.mulf %170, %169 : vector<8x8xf32>
    %172 = arith.addf %166, %171 : vector<8x8xf32>
    %c6_75 = arith.constant 6 : index
    %c2_76 = arith.constant 2 : index
    %173 = memref.load %arg2[%c6_75, %c2_76] : memref<8x4xf32, #tpu.memory_space<smem>>
    %174 = vector.extract_strided_slice %5 {offsets = [2, 0, 0], sizes = [1, 8, 8], strides = [1, 1, 1]} : vector<4x8x8xf32> to vector<1x8x8xf32>
    %175 = vector.shape_cast %174 : vector<1x8x8xf32> to vector<8x8xf32>
    %176 = vector.broadcast %173 : f32 to vector<8x8xf32>
    %177 = arith.mulf %176, %175 : vector<8x8xf32>
    %178 = arith.addf %172, %177 : vector<8x8xf32>
    %c6_77 = arith.constant 6 : index
    %c3_78 = arith.constant 3 : index
    %179 = memref.load %arg2[%c6_77, %c3_78] : memref<8x4xf32, #tpu.memory_space<smem>>
    %180 = vector.extract_strided_slice %5 {offsets = [3, 0, 0], sizes = [1, 8, 8], strides = [1, 1, 1]} : vector<4x8x8xf32> to vector<1x8x8xf32>
    %181 = vector.shape_cast %180 : vector<1x8x8xf32> to vector<8x8xf32>
    %182 = vector.broadcast %179 : f32 to vector<8x8xf32>
    %183 = arith.mulf %182, %181 : vector<8x8xf32>
    %184 = arith.addf %178, %183 : vector<8x8xf32>
    %c0_79 = arith.constant 0 : index
    %c6_80 = arith.constant 6 : index
    %c0_81 = arith.constant 0 : index
    %c0_82 = arith.constant 0 : index
    %185 = vector.load %arg5[%c0_79, %c6_80, %c0_81, %c0_82] : memref<1x8x8x8xf32, #tpu.memory_space<vmem>>, vector<1x1x8x8xf32>
    %186 = vector.shape_cast %185 : vector<1x1x8x8xf32> to vector<8x8xf32>
    %187 = vector.shape_cast %184 : vector<8x8xf32> to vector<1x1x8x8xf32>
    tpu.vector_store %arg5[%c0_79, %c6_80, %c0_81, %c0_82], %187 {strides = array<i32>} : memref<1x8x8x8xf32, #tpu.memory_space<vmem>>, vector<1x1x8x8xf32>,
    %c7 = arith.constant 7 : index
    %c0_83 = arith.constant 0 : index
    %188 = memref.load %arg2[%c7, %c0_83] : memref<8x4xf32, #tpu.memory_space<smem>>
    %189 = vector.extract_strided_slice %5 {offsets = [0, 0, 0], sizes = [1, 8, 8], strides = [1, 1, 1]} : vector<4x8x8xf32> to vector<1x8x8xf32>
    %190 = vector.shape_cast %189 : vector<1x8x8xf32> to vector<8x8xf32>
    %191 = vector.broadcast %188 : f32 to vector<8x8xf32>
    %192 = arith.mulf %191, %190 : vector<8x8xf32>
    %c7_84 = arith.constant 7 : index
    %c1_85 = arith.constant 1 : index
    %193 = memref.load %arg2[%c7_84, %c1_85] : memref<8x4xf32, #tpu.memory_space<smem>>
    %194 = vector.extract_strided_slice %5 {offsets = [1, 0, 0], sizes = [1, 8, 8], strides = [1, 1, 1]} : vector<4x8x8xf32> to vector<1x8x8xf32>
    %195 = vector.shape_cast %194 : vector<1x8x8xf32> to vector<8x8xf32>
    %196 = vector.broadcast %193 : f32 to vector<8x8xf32>
    %197 = arith.mulf %196, %195 : vector<8x8xf32>
    %198 = arith.addf %192, %197 : vector<8x8xf32>
    %c7_86 = arith.constant 7 : index
    %c2_87 = arith.constant 2 : index
    %199 = memref.load %arg2[%c7_86, %c2_87] : memref<8x4xf32, #tpu.memory_space<smem>>
    %200 = vector.extract_strided_slice %5 {offsets = [2, 0, 0], sizes = [1, 8, 8], strides = [1, 1, 1]} : vector<4x8x8xf32> to vector<1x8x8xf32>
    %201 = vector.shape_cast %200 : vector<1x8x8xf32> to vector<8x8xf32>
    %202 = vector.broadcast %199 : f32 to vector<8x8xf32>
    %203 = arith.mulf %202, %201 : vector<8x8xf32>
    %204 = arith.addf %198, %203 : vector<8x8xf32>
    %c7_88 = arith.constant 7 : index
    %c3_89 = arith.constant 3 : index
    %205 = memref.load %arg2[%c7_88, %c3_89] : memref<8x4xf32, #tpu.memory_space<smem>>
    %206 = vector.extract_strided_slice %5 {offsets = [3, 0, 0], sizes = [1, 8, 8], strides = [1, 1, 1]} : vector<4x8x8xf32> to vector<1x8x8xf32>
    %207 = vector.shape_cast %206 : vector<1x8x8xf32> to vector<8x8xf32>
    %208 = vector.broadcast %205 : f32 to vector<8x8xf32>
    %209 = arith.mulf %208, %207 : vector<8x8xf32>
    %210 = arith.addf %204, %209 : vector<8x8xf32>
    %c0_90 = arith.constant 0 : index
    %c7_91 = arith.constant 7 : index
    %c0_92 = arith.constant 0 : index
    %c0_93 = arith.constant 0 : index
    %211 = vector.load %arg5[%c0_90, %c7_91, %c0_92, %c0_93] : memref<1x8x8x8xf32, #tpu.memory_space<vmem>>, vector<1x1x8x8xf32>
    %212 = vector.shape_cast %211 : vector<1x1x8x8xf32> to vector<8x8xf32>
    %213 = vector.shape_cast %210 : vector<8x8xf32> to vector<1x1x8x8xf32>
    tpu.vector_store %arg5[%c0_90, %c7_91, %c0_92, %c0_93], %213 {strides = array<i32>} : memref<1x8x8x8xf32, #tpu.memory_space<vmem>>, vector<1x1x8x8xf32>,
    return
  }
  func.func @transform_0(%arg0: i32, %arg1: i32, %arg2: memref<8x4xf32, #tpu.memory_space<smem>>) -> (i32, i32, i32, i32) {
    %c0_i32 = arith.constant 0 : i32
    %c0_i32_0 = arith.constant 0 : i32
    %c0_i32_1 = arith.constant 0 : i32
    return %arg0, %c0_i32, %arg1, %c0_i32_0 : i32, i32, i32, i32
  }
  func.func @transform_1(%arg0: i32, %arg1: i32, %arg2: memref<8x4xf32, #tpu.memory_space<smem>>) -> (i32, i32) {
    %c0_i32 = arith.constant 0 : i32
    %c0_i32_0 = arith.constant 0 : i32
    %c0_i32_1 = arith.constant 0 : i32
    return %c0_i32, %c0_i32_0 : i32, i32
  }
  func.func @transform_2(%arg0: i32, %arg1: i32, %arg2: memref<8x4xf32, #tpu.memory_space<smem>>) -> (i32, i32, i32, i32) {
    %c0_i32 = arith.constant 0 : i32
    %c0_i32_0 = arith.constant 0 : i32
    %c0_i32_1 = arith.constant 0 : i32
    return %arg0, %c0_i32, %arg1, %c0_i32_0 : i32, i32, i32, i32
  }
}

</mosaic_0001>

<bundles_post_ra>
// kernel: tpu_custom_call.1
= control target key start
LH: loop header
LB: loop body
LE: loop exit
PB: predicated region body
PF: predicated region fallthrough
CT: control target
= control target key end

     0   :  { %s1113_s0 = inlined_call_operand.vmem [shape: f32[8,4], index: 0, kind: input, shape index: {}]   ;;  %s1114_s1 = inlined_call_operand.hbm [shape: f32[2,4,8,32], index: 1, kind: input, shape index: {}]   ;;  %s1115_s2 = inlined_call_operand.vmem [shape: f32[32,8], index: 2, kind: input, shape index: {}]   ;;  %s1116_s3 = inlined_call_operand.hbm [shape: f32[2,8,8,8], index: 3, kind: output, shape index: {}]  }
   0x1   :  { %1130 = sst [smem:[#allocation23_spill]] %s1114_s1  ;;  %s8_s14 = sshll.u32 %s1113_s0, 4  ;;  %s9_s14 = int_to_ptr.vmem [resolvable:$true] %s8_s14 }
   0x2   :  { %1131 = sst [smem:[#allocation24_spill]] %s1115_s2  ;;  %s684_s15 = scalar_lea.vmem %s9_s14, 128 }
   0x3   :  { %1132 = sst [smem:[#allocation25_spill]] %s1116_s3  ;;  %p685_p0 = scmp.ne.s32.totalorder %s9_s14, %s684_s15 }
   0x4   :  { %p689_p1 = scmp.lt.s32.totalorder %s9_s14, %s9_s14  ;;  %p690_p2 = scmp.lt.s32.totalorder %s684_s15, %s684_s15 }
   0x6   :  { %p691_p3 = por %p690_p2, %p689_p1 }
   0x8   :  { %p692_p4 = pnand %p691_p3, %p685_p0 }
   0xa   :  { %695 = shalt.err (!%p692_p4)  }
   0xb   :  { %s808_s16 = smov [#allocation3]  }
   0xc   :  { %11 = dma.vmem_to_smem %s9_s14, 128, %s808_s16, [#allocation2] }
   0xd   :  { %774 = dma.done.wait [#allocation2], 128 }
   0xe   :  { %775 = vsyncadd [#allocation2], 4294967168 }
   0xf   :  { %13 = sfence }
  0x10   :  { %14 = vsyncpa [#allocation5], 0 }
  0x11   :  { %16 = vsyncpa [#allocation5 + $0x1], 0 }
  0x12   :  { %17 = vsyncpa [#allocation6], 0 }
  0x13   :  { %19 = vsyncpa [#allocation6 + $0x1], 0  ;;  %s838_s17 = smov 0   ;;  %s840_s0 = smov 0  }
  0x14   :  { %s842_s18 = smov 0   ;;  %s844_s19 = smov 0  }
  0x15   :  { %s846_s20 = smov 0   ;;  %s848_s21 = smov 0  }
  0x16 LB: > { %1133 = sst [smem:[#allocation11_spill]] %s786_s17  ;;  %s528_s22 = sadd.s32 4294967295, %s806_s21   ;;  %s806_s21 = sphi %s848_s21, %s25_s21   ;;  %s802_s20 = sphi %s846_s20, %s1165_s20   ;;  %s798_s19 = sphi %s844_s19, %s1164_s19   ;;  %s794_s18 = sphi %s842_s18, %s1163_s18   ;;  %s790_s0 = sphi %s840_s0, %s1162_s0   ;;  %s786_s17 = sphi %s838_s17, %s1161_s17  }
  0x17   : > { %1134 = sst [smem:[#allocation12_spill]] %s790_s0  ;;  %s529_s23 = sadd.s32 4294967294, %s806_s21  }
  0x18   : > { %1135 = sst [smem:[#allocation13_spill]] %s794_s18  ;;  %s37_s24 = sadd.s32 1, %s802_s20 }
  0x19   : > { %1136 = sst [smem:[#allocation14_spill]] %s798_s19  ;;  %s46_s25 = sadd.s32 1, %s794_s18 }
  0x1a   : > { %1137 = sst [smem:[#allocation15_spill]] %s802_s20  ;;  %p39_p5 = scmp.ge.s32.totalorder %s37_s24, 2 }
  0x1b   : > { %1138 = sst [smem:[#allocation16_spill]] %s806_s21  ;;  %p53_p6 = scmp.ne.s32.totalorder %s794_s18, %s790_s0 }
  0x1c   : > { %p54_p7 = scmp.eq.s32.totalorder %s806_s21, 0  ;;  %p59_p8 = scmp.ne.s32.totalorder %s790_s0, %s786_s17 }
  0x1d   : > { %s1167_s24 = smov (%p39_p5, %s37_s24), 0  ;;  %p60_p10 = scmp.eq.s32.totalorder %s528_s22, 0 }
  0x1e   : > { %1139 = sst [smem:[#allocation17_spill]] %s1167_s24  ;;  %p879_p9 = por %p54_p7, %p53_p6 }
  0x1f   : > { %s41_s27 = ssub.s32 %s802_s20, %s1167_s24  ;;  %p106_p11 = scmp.eq.s32.totalorder %s528_s22, 1 }
  0x20   : > { %p44_p12 = scmp.eq.s32.totalorder %s41_s27, 0  ;;  %p885_p13 = por %p60_p10, %p59_p8 }
  0x21   : > { %p889_p0 = por %p106_p11, %p53_p6  ;;  %p112_p1 = scmp.eq.s32.totalorder %s529_s23, 1 }
  0x22   : > { %s894_s30 = scalar_select %p44_p12, %s794_s18, %s46_s25  }
  0x23   : > { %s1142_s29 = scalar_select %p889_p0, 1, 0 }
  0x24   : > { %1144 = sst [smem:[#allocation19_spill]] %s894_s30  ;;  %p896_p2 = por %p112_p1, %p59_p8 }
  0x25   : > { %1143 = sst [smem:[#allocation18_spill]] %s1142_s29  ;;  %p629_p4 = scmp.lt.s32.totalorder %s806_s21, 2 }
  0x26   : > { %s1145_s4 = scalar_select %p896_p2, 1, 0 }
  0x27   : > { %s135_s5 = sand.u32 1, %s794_s18   ;;  %s585_s7 = sshll.u32 %s802_s20, 9 }
  0x28   : > { %1146 = sst [smem:[#allocation20_spill]] %s1145_s4  ;;  %s532_s6 = sshll.u32 %s135_s5, 5 }
  0x29   : > { %s1147_s1 = sld [smem:[#allocation23_spill]]  ;;  %s139_s11 = scalar_lea.vmem [#allocation4], %s532_s6 }
  0x2a   : > { %s147_s12 = sshll.u32 %s139_s11, 4  ;;  %p909_p5 = pnand %p629_p4, %p879_p9  ;;  %s148_s12 = int_to_ptr.vmem [resolvable:$true] %s147_s12 }
  0x2b   : > { %p535_p6 = scmp.ge.s32.totalorder %s806_s21, 1  ;;  %s136_s14 = scalar_lea.sflag [#allocation5], %s135_s5 }
  0x2c   : > { %p698_p7 = pneg %p909_p5  ;;  %s709_s15 = scalar_lea.vmem %s148_s12, 512 }
  0x2d   : > { %p710_p8 = scmp.ne.s32.totalorder %s148_s12, %s709_s15  ;;  %s809_s16 = smov [#allocation4]  }
  0x2e   : > { %s714_s22 = sshll.u32 %s809_s16, 4  ;;  %s715_s22 = int_to_ptr.vmem [resolvable:$false] %s714_s22 }
  0x2f   : > { %s146_s10 = scalar_lea.hbm %s1147_s1, %s585_s7  ;;  %p712_p10 = pnand %p710_p8, %p698_p7 }
  0x30   : > { %s716_s23 = scalar_lea.vmem %s715_s22, 1024  ;;  %p717_p12 = scmp.lt.s32.totalorder %s148_s12, %s715_s22 }
  0x31   : > { %p713_p11 = pneg %p712_p10  ;;  %p718_p1 = scmp.lt.s32.totalorder %s716_s23, %s709_s15 }
  0x33   : > { %p719_p3 = por %p718_p1, %p717_p12 }
  0x35   : > { %p720_p9 = pnand %p719_p3, %p713_p11 }
  0x37   : > { %723 = shalt.err (!%p720_p9)
}
  0x38   : > { %s810_s25 = smov 128   ;;  %s811_s26 = smov 8  }
  0x39   : > { %624 = dma.hbm_to_vmem [thread:$0]  (!%p909_p5), %s146_s10, 512, %s148_s12, %s136_s14, %s810_s25, %s810_s25, %s811_s26  }
  0x3a   : > { %p155_p4 = scmp.lt.s32.totalorder %s806_s21, 3 }
  0x3c   : > { %p156_p7 = pnand %p535_p6, %p155_p4 }
  0x3e   : > { %159 = sbr.rel (%p156_p7) target bundleno = 310 (0x136), region = 28 }
  0x43   : > { %s922_s27 = sand.u32 1, %s790_s0  }
  0x44   : > { %1149 = sst [smem:[#allocation21_spill]] %s922_s27  ;;  %s536_s5 = sshll.u32 %s922_s27, 5 }
  0x45   : > { %s162_s6 = scalar_lea.sflag [#allocation5], %s922_s27  ;;  %s165_s7 = scalar_lea.vmem [#allocation4], %s536_s5 }
  0x46   : > { %777 = dma.done.wait (%p885_p13), %s162_s6, 512  }
  0x47   : > { %779 = vsyncadd (%p885_p13), %s162_s6, 4294966784  ;;  %s1150_s2 = sld [smem:[#allocation24_spill]]  ;;  %v186_v4 = vld [vmem:[%s165_s7] sm:$0xff]  ;;  %vm194_vm0 = vcmask 261120   ;;  %v188_v5 = vld [vmem:[%s165_s7 + $0x10] sm:$0xff]  ;;  %vm307_vm1 = vcmask 64512  }
  0x48   : > { %v187_v6 = vld [vmem:[%s165_s7 + $0x8] sm:$0xff]  ;;  %v189_v7 = vld [vmem:[%s165_s7 + $0x18] sm:$0xff]  ;;  %603 = vmatprep.mubr.msk.f32.mxu0 %vm194_vm0, %v186_v4  ;;  %606 = vmatprep.mubr.msk.f32.mxu1 %vm194_vm0, %v188_v5  ;;  %s942_s15 = sld [smem:[#allocation3 + $0x1]] }
  0x49   : > { %s944_s16 = sld [smem:[#allocation3 + $0x3]] }
  0x4a   : > { %s946_s22 = sld [smem:[#allocation3 + $0x83]] }
  0x4b   : > { %s948_s23 = sld [smem:[#allocation3 + $0x103]] }
  0x4c   : > { %s950_s25 = sld [smem:[#allocation3 + $0x183]] }
  0x4d   : > { %v193_v0 = vld [vmem:[%s1150_s2 + $0x18] sm:$0xff]  ;;  %v192_v1 = vld [vmem:[%s1150_s2 + $0x10] sm:$0xff]  ;;  %v191_v2 = vld [vmem:[%s1150_s2 + $0x8] sm:$0xff]  ;;  %s952_s26 = sld [smem:[#allocation3 + $0x203]] }
  0x4e   : > { %595 = vmatprep.subr.mxu0 %v193_v0  ;;  %609 = vmatprep.subr.mxu1 %v193_v0  ;;  %v190_v3 = vld [vmem:[%s1150_s2] sm:$0xff]  ;;  %s954_s5 = sld [smem:[#allocation3 + $0x283]]  ;;  %v296_v10 = vstv %s942_s15 }
  0x4f   : > { %596 = vmatpush3.msra.mxu0 %v193_v0  ;;  %613 = vmatpush3.msra.mxu1 %v193_v0  ;;  %s956_s6 = sld [smem:[#allocation3 + $0x303]]  ;;  %v304_v8 = vstv %s944_s16 }
  0x50   : > { %597 = vmatprep.subr.mxu0 %v192_v1  ;;  %610 = vmatprep.subr.mxu1 %v192_v1  ;;  %s958_s7 = sld [smem:[#allocation3 + $0x383]]  ;;  %v321_v9 = vstv %s946_s22 }
  0x51   : > { %598 = vmatpush3.msra.mxu0 %v192_v1  ;;  %614 = vmatpush3.msra.mxu1 %v192_v1  ;;  %s960_s8 = sld [smem:[#allocation3]]  ;;  %v338_v11 = vstv %s948_s23 }
  0x52   : > { %599 = vmatprep.subr.mxu0 %v191_v2  ;;  %611 = vmatprep.subr.mxu1 %v191_v2  ;;  %s962_s9 = sld [smem:[#allocation3 + $0x80]]  ;;  %v355_v12 = vstv %s950_s25 }
  0x53   : > { %600 = vmatpush3.msra.mxu0 %v191_v2  ;;  %615 = vmatpush3.msra.mxu1 %v191_v2  ;;  %s964_s10 = sld [smem:[#allocation3 + $0x81]]  ;;  %v372_v13 = vstv %s952_s26 }
  0x54   : > { %601 = vmatprep.subr.mxu0 %v190_v3  ;;  %612 = vmatprep.subr.mxu1 %v190_v3  ;;  %s966_s11 = sld [smem:[#allocation3 + $0x100]]  ;;  %v389_v14 = vstv %s954_s5 }
  0x55   : > { %602 = vmatpush3.msra.mxu0 %v190_v3  ;;  %616 = vmatpush3.msra.mxu1 %v190_v3  ;;  %s968_s12 = sld [smem:[#allocation3 + $0x101]]  ;;  %v406_v15 = vstv %s956_s6 }
  0x56   : > { %604 = vmatmul.mubr.msk.f32.vlgmr.msra.gmra.mxu0 %vm194_vm0, %v187_v6  ;;  %607 = vmatmul.mubr.msk.f32.vlgmr.msra.gmra.mxu1 %vm194_vm0, %v189_v7  ;;  %s970_s13 = sld [smem:[#allocation3 + $0x180]]  ;;  %v423_v16 = vstv %s958_s7 }
  0x57   : > { %s972_s28 = sld [smem:[#allocation3 + $0x181]]  ;;  %v293_v17 = vstv %s960_s8 }
  0x58   : > { %s974_s14 = sld [smem:[#allocation3 + $0x200]]  ;;  %v310_v18 = vstv %s962_s9 }
  0x59   : > { %s976_s1 = sld [smem:[#allocation3 + $0x201]]  ;;  %v313_v19 = vstv %s964_s10 }
  0x5a   : > { %s978_s2 = sld [smem:[#allocation3 + $0x280]]  ;;  %v327_v20 = vstv %s966_s11 }
  0x5b   : > { %s980_s24 = sld [smem:[#allocation3 + $0x281]]  ;;  %v330_v21 = vstv %s968_s12 }
  0x5c   : > { %s982_s20 = sld [smem:[#allocation3 + $0x300]]  ;;  %v344_v22 = vstv %s970_s13 }
  0x5d   : > { %s984_s30 = sld [smem:[#allocation3 + $0x301]]  ;;  %v347_v23 = vstv %s972_s28 }
  0x5e   : > { %s986_s18 = sld [smem:[#allocation3 + $0x380]]  ;;  %v361_v24 = vstv %s974_s14 }
  0x5f   : > { %s988_s0 = sld [smem:[#allocation3 + $0x381]]  ;;  %v364_v25 = vstv %s976_s1 }
  0x60   : > { %s990_s21 = sld [smem:[#allocation3 + $0x2]]  ;;  %v378_v26 = vstv %s978_s2 }
  0x61   : > { %s992_s4 = sld [smem:[#allocation3 + $0x82]]  ;;  %v381_v27 = vstv %s980_s24 }
  0x62   : > { %s994_s17 = sld [smem:[#allocation3 + $0x102]]  ;;  %v395_v28 = vstv %s982_s20 }
  0x63   : > { %s996_s3 = sld [smem:[#allocation3 + $0x182]]  ;;  %v398_v29 = vstv %s984_s30 }
  0x64   : > { %s998_s29 = sld [smem:[#allocation3 + $0x202]]  ;;  %v412_v30 = vstv %s986_s18 }
  0x65   : > { %s1000_s19 = sld [smem:[#allocation3 + $0x282]]  ;;  %v415_v31 = vstv %s988_s0 }
  0x66   : > { %s1002_s27 = sld [smem:[#allocation3 + $0x302]]  ;;  %v300_v32 = vstv %s990_s21 }
  0x67   : > { %v317_v33 = vstv %s992_s4  ;;  %s1153_s1 = sld [smem:[#allocation21_spill]] }
  0x68   : > { %1151 = sst [smem:[#allocation22_spill]] %s994_s17 }
  0x69   : > { %s1007_s17 = sld [smem:[#allocation3 + $0x382]]  ;;  %v351_v37 = vstv %s996_s3 }
  0x6a   : > { %s1152_s15 = sld [smem:[#allocation22_spill]]  ;;  %v368_v38 = vstv %s998_s29 }
  0x6b   : > { %v385_v39 = vstv %s1000_s19  ;;  %s1154_s3 = sld [smem:[#allocation14_spill]] }
  0x6c   : > { %v402_v40 = vstv %s1002_s27  ;;  %s1156_s24 = sld [smem:[#allocation25_spill]]  ;;  %s812_s27 = smov [#allocation7]  }
  0x6d   : > { %s537_s2 = sshll.u32 %s1153_s1, 6  ;;  %s429_s30 = scalar_lea.sflag [#allocation6], %s1153_s1 }
  0x6e   : > { %s185_s0 = scalar_lea.vmem [#allocation7], %s537_s2  ;;  %s728_s16 = sshll.u32 %s812_s27, 4  ;;  %s729_s16 = int_to_ptr.vmem [resolvable:$false] %s728_s16 }
  0x6f   : > { %v419_v44 = vstv %s1007_s17  ;;  %s443_s18 = sshll.u32 %s185_s0, 4  ;;  %s730_s22 = scalar_lea.vmem %s729_s16, 2048  ;;  %s1062_s18 = int_to_ptr.vmem [resolvable:$true] %s443_s18 }
  0x70   : > { %v334_v34 = vstv %s1152_s15  ;;  %s724_s4 = scalar_lea.vmem %s1062_s18, 1024  ;;  %p731_p6 = scmp.lt.s32.totalorder %s1062_s18, %s729_s16 }
  0x71   : > { %s586_s17 = sshll.u32 %s1154_s3, 10  ;;  %p725_p13 = scmp.ne.s32.totalorder %s1062_s18, %s724_s4 }
  0x72   : > { %s1060_s29 = scalar_lea.hbm %s1156_s24, %s586_s17  ;;  %p732_p8 = scmp.lt.s32.totalorder %s730_s22, %s724_s4 }
  0x73   : > { %p726_p3 = pnand %p725_p13, %p889_p0 }
  0x74   : > { %p733_p10 = por %p732_p8, %p731_p6 }
  0x75   : > { %p727_p5 = pneg %p726_p3 }
  0x77   : > { %p734_p11 = pnand %p733_p10, %p727_p5 }
 0x116   : > { %v605_v35 = vpop.f32.mrf.mxu0  ;;  %v1033_v36 = vpop.f32.mrf.mxu1 }
 0x117   : > { %v305_v41 = vmul.f32 %v1033_v36, %v304_v8  ;;  %v322_v42 = vmul.f32 %v1033_v36, %v321_v9  ;;  %v339_v43 = vmul.f32 %v1033_v36, %v338_v11  ;;  %v356_v45 = vmul.f32 %v1033_v36, %v355_v12 }
 0x118   : > { %v373_v46 = vmul.f32 %v1033_v36, %v372_v13  ;;  %v390_v47 = vmul.f32 %v1033_v36, %v389_v14  ;;  %v407_v48 = vmul.f32 %v1033_v36, %v406_v15  ;;  %v273_v49 = vpop.f32.mrf.mxu0  ;;  %v297_v51 = vmul.f32 %v605_v35, %v296_v10  ;;  %v283_v62 = vpop.f32.mrf.mxu1 }
 0x119   : > { %v294_v50 = vmul.f32 %v293_v17, %v273_v49  ;;  %v311_v52 = vmul.f32 %v310_v18, %v273_v49  ;;  %v314_v53 = vmul.f32 %v605_v35, %v313_v19  ;;  %v328_v54 = vmul.f32 %v327_v20, %v273_v49 }
 0x11a   : > { %v331_v55 = vmul.f32 %v605_v35, %v330_v21  ;;  %v345_v56 = vmul.f32 %v344_v22, %v273_v49  ;;  %v348_v57 = vmul.f32 %v605_v35, %v347_v23  ;;  %v362_v60 = vmul.f32 %v361_v24, %v273_v49 }
 0x11b   : > { %v298_v58 = vadd.f32 %v297_v51, %v294_v50  ;;  %v315_v59 = vadd.f32 %v314_v53, %v311_v52  ;;  %v365_v61 = vmul.f32 %v605_v35, %v364_v25  ;;  %v379_v1 = vmul.f32 %v378_v26, %v273_v49 }
 0x11c   : > { %v332_v63 = vadd.f32 %v331_v55, %v328_v54  ;;  %v349_v0 = vadd.f32 %v348_v57, %v345_v56  ;;  %v382_v2 = vmul.f32 %v605_v35, %v381_v27  ;;  %v396_v4 = vmul.f32 %v395_v28, %v273_v49 }
 0x11d   : > { %v366_v3 = vadd.f32 %v365_v61, %v362_v60  ;;  %v399_v5 = vmul.f32 %v605_v35, %v398_v29  ;;  %v413_v6 = vmul.f32 %v412_v30, %v273_v49  ;;  %v416_v8 = vmul.f32 %v605_v35, %v415_v31 }
 0x11e   : > { %v383_v7 = vadd.f32 %v382_v2, %v379_v1  ;;  %v301_v9 = vmul.f32 %v300_v32, %v283_v62  ;;  %v318_v10 = vmul.f32 %v317_v33, %v283_v62  ;;  %v335_v12 = vmul.f32 %v334_v34, %v283_v62 }
 0x11f   : > { %v400_v11 = vadd.f32 %v399_v5, %v396_v4  ;;  %v352_v13 = vmul.f32 %v351_v37, %v283_v62  ;;  %v369_v14 = vmul.f32 %v368_v38, %v283_v62  ;;  %v417_v15 = vadd.f32 %v416_v8, %v413_v6 }
 0x120   : > { %v302_v17 = vadd.f32 %v301_v9, %v298_v58  ;;  %v319_v18 = vadd.f32 %v318_v10, %v315_v59  ;;  %v386_v19 = vmul.f32 %v385_v39, %v283_v62  ;;  %v336_v20 = vadd.f32 %v335_v12, %v332_v63 }
 0x121   : > { %v353_v21 = vadd.f32 %v352_v13, %v349_v0  ;;  %v370_v22 = vadd.f32 %v369_v14, %v366_v3  ;;  %v403_v23 = vmul.f32 %v402_v40, %v283_v62  ;;  %v420_v27 = vmul.f32 %v419_v44, %v283_v62 }
 0x122   : > { %v306_v24 = vadd.f32 %v305_v41, %v302_v17  ;;  %v323_v25 = vadd.f32 %v322_v42, %v319_v18  ;;  %v387_v26 = vadd.f32 %v386_v19, %v383_v7  ;;  %v340_v28 = vadd.f32 %v339_v43, %v336_v20 }
 0x123   : > { %v357_v29 = vadd.f32 %v356_v45, %v353_v21  ;;  %v374_v30 = vadd.f32 %v373_v46, %v370_v22  ;;  %v404_v31 = vadd.f32 %v403_v23, %v400_v11  ;;  %v424_v32 = vmul.f32 %v1033_v36, %v423_v16 }
 0x124   : > { %308 = vst.msk [vmem:[%s185_s0] sm:$0xff] %vm307_vm1, %v306_v24  ;;  %549 = vst.msk [vmem:[%s185_s0 + $0x8] sm:$0xff] %vm307_vm1, %v323_v25  ;;  %v391_v33 = vadd.f32 %v390_v47, %v387_v26  ;;  %v421_v34 = vadd.f32 %v420_v27, %v417_v15 }
 0x125   : > { %554 = vst.msk [vmem:[%s185_s0 + $0x10] sm:$0xff] %vm307_vm1, %v340_v28  ;;  %559 = vst.msk [vmem:[%s185_s0 + $0x18] sm:$0xff] %vm307_vm1, %v357_v29  ;;  %v408_v35 = vadd.f32 %v407_v48, %v404_v31 }
 0x126   : > { %564 = vst.msk [vmem:[%s185_s0 + $0x20] sm:$0xff] %vm307_vm1, %v374_v30  ;;  %569 = vst.msk [vmem:[%s185_s0 + $0x28] sm:$0xff] %vm307_vm1, %v391_v33  ;;  %v425_v16 = vadd.f32 %v424_v32, %v421_v34 }
 0x127   : > { %574 = vst.msk [vmem:[%s185_s0 + $0x30] sm:$0xff] %vm307_vm1, %v408_v35 }
 0x128   : > { %579 = vst.msk [vmem:[%s185_s0 + $0x38] sm:$0xff] %vm307_vm1, %v425_v16 }
 0x129   : > { %737 = shalt.err (!%p734_p11)
}
 0x12a   : > { %s738_s23 = scalar_lea.hbm %s1060_s29, 1024  ;;  %s742_s5 = scalar_lea.hbm %s1156_s24, 2048 }
 0x12b   : > { %p739_p12 = scmp.ne.s32.totalorder %s1060_s29, %s738_s23  ;;  %p743_p4 = scmp.lt.s32.totalorder %s1060_s29, %s1156_s24 }
 0x12c   : > { %p744_p7 = scmp.lt.s32.totalorder %s742_s5, %s738_s23 }
 0x12d   : > { %p740_p1 = pnand %p739_p12, %p889_p0 }
 0x12e   : > { %p745_p13 = por %p744_p7, %p743_p4 }
 0x12f   : > { %p741_p9 = pneg %p740_p1 }
 0x131   : > { %p746_p3 = pnand %p745_p13, %p741_p9 }
 0x133   : > { %749 = shalt.err (!%p746_p3)
}
 0x134   : > { %s813_s8 = smov 128   ;;  %s814_s9 = smov 8  }
 0x135   : > { %619 = dma.vmem_to_hbm [thread:$0]  (%p889_p0), %s1062_s18, 1024, %s1060_s29, %s429_s30, %s813_s8, %s813_s8, %s814_s9  }
 0x136 PF: > { %s1157_s10 = sld [smem:[#allocation11_spill]] }
 0x137   : > { %s1159_s12 = sld [smem:[#allocation16_spill]] }
 0x13c   : > { %s458_s13 = sand.u32 1, %s1157_s10  }
 0x13d   : > { %p1160_p5 = scmp.ge.s32.totalorder %s1159_s12, 2  ;;  %s459_s28 = scalar_lea.sflag [#allocation6], %s458_s13 }
 0x13f   : > { %p626_p6 = pnand %p1160_p5, %p896_p2 }
 0x141   : > { %p627_p8 = pneg %p626_p6 }
 0x143   : > { %781 = dma.done.wait (%p627_p8), %s459_s28, 1024  }
 0x144   : > { %783 = vsyncadd (%p627_p8), %s459_s28, 4294966272  ;;  %s25_s21 = sadd.s32 1, %s1159_s12   ;;  %s1161_s17 = sld [smem:[#allocation12_spill]] }
 0x145   : > { %p22_p10 = scmp.ge.s32.totalorder %s25_s21, 4   ;;  %s1162_s0 = sld [smem:[#allocation13_spill]] }
 0x146   : > { %s1163_s18 = sld [smem:[#allocation19_spill]] }
 0x147   : > { %s1164_s19 = sld [smem:[#allocation15_spill]]  ;;  %24 = sbr.rel (!%p22_p10) target bundleno = 22 (0x16), region = 80 }
 0x148   : > { %s1165_s20 = sld [smem:[#allocation17_spill]] }
 0x14c   :  { %464 = vsyncpa [#allocation5], 1 }
 0x14d   :  { %466 = vsyncpa [#allocation5 + $0x1], 1 }
 0x14e   :  { %467 = vsyncpa [#allocation6], 1 }
 0x14f   :  { %469 = vsyncpa [#allocation6 + $0x1], 1 }

</bundles_post_ra>
